<compile_context>
chip_gen: v5e
topology: v5e:2x2
jax: 0.10.0
libtpu: 0.0.40
codegen_flags: <defaults>
</compile_context>

<pallas_src>
import jax
import jax.numpy as jnp
from jax import lax
from jax.experimental import pallas as pl
from jax.experimental.pallas import tpu as pltpu
import numpy as np


def _round_up(x, m):
    return ((x + m - 1) // m) * m


def _tpu_vmem_capacity_bytes():
    try:
        return int(pltpu.get_tpu_info().vmem_capacity_bytes)
    except Exception:
        return 64 * 1024 * 1024  # conservative fallback (v7x per-core VMEM)


def _seq_tile(total, nt):
    """Sequence tile for `total` frames split into <= nt tiles.

    Returns either a multiple of 8 (< total) or the full dimension, so the
    BlockSpec (8, 128) layout rule is always satisfied for the sublane axis.
    """
    tt = _round_up(pl.cdiv(total, nt), 8)
    return total if tt >= total else tt


def _make_head_kernel(*, t_f, t_h, tt_f, tt_h, nt_f, nt_h, nt):
    """Fused streaming-mean + projection-head kernel (grid = (batch, seq))."""

    def kernel(feat_ref, hs_ref, mask_ref,
               w_pf_ref, b_pf_ref, w_ph_ref, b_ph_ref,
               wd_f_ref, wd_h_ref, b_d_ref, w_o_ref, b_o_ref,
               out_ref, fsum_ref, hsum_ref, msum_ref):
        t = pl.program_id(1)

        @pl.when(t == 0)
        def _():
            fsum_ref[...] = jnp.zeros_like(fsum_ref)
            hsum_ref[...] = jnp.zeros_like(hsum_ref)
            msum_ref[...] = jnp.zeros_like(msum_ref)

        # ---- masked feature accumulation (f32) ----
        start_f = jnp.minimum(t, nt_f - 1) * tt_f
        pos_f = start_f + lax.broadcasted_iota(jnp.int32, (1, tt_f, 1), 1)
        valid_f = jnp.logical_and(pos_f < t_f, t < nt_f)          # (1, tt_f, 1)
        m = jnp.where(valid_f, mask_ref[...].astype(jnp.float32), 0.0)
        feats = jnp.where(valid_f, feat_ref[...].astype(jnp.float32), 0.0)
        fsum_ref[...] += jnp.sum(feats * m, axis=1, keepdims=True)  # (Bt,1,F)
        msum_ref[...] += jnp.sum(m, axis=1, keepdims=True)          # (Bt,1,1)

        # ---- hidden_states accumulation (plain mean numerator, f32) ----
        start_h = jnp.minimum(t, nt_h - 1) * tt_h
        pos_h = start_h + lax.broadcasted_iota(jnp.int32, (1, tt_h, 1), 1)
        valid_h = jnp.logical_and(pos_h < t_h, t < nt_h)          # (1, tt_h, 1)
        hs = jnp.where(valid_h, hs_ref[...].astype(jnp.float32), 0.0)
        hsum_ref[...] += jnp.sum(hs, axis=1, keepdims=True)         # (Bt,1,H)

        # ---- finalize: means + projection head on the last reduction step ----
        @pl.when(t == nt - 1)
        def _():
            fmean = (fsum_ref[...] / msum_ref[...])[:, 0, :]        # (Bt, F)
            hmean = (hsum_ref[...] * (1.0 / t_h))[:, 0, :]          # (Bt, H)

            # pre_mean_features / pre_mean_wv2 applied AFTER the means (linearity).
            fproj = (jnp.dot(fmean, w_pf_ref[...],
                             preferred_element_type=jnp.float32) + b_pf_ref[...])
            hproj = (jnp.dot(hmean, w_ph_ref[...],
                             preferred_element_type=jnp.float32) + b_ph_ref[...])

            # dense on cat((features, hidden_states), -1) as a split matmul:
            # [fproj | hproj] @ W_d == fproj @ Wd_f + hproj @ Wd_h  (no concat).
            d = (jnp.dot(fproj, wd_f_ref[...], preferred_element_type=jnp.float32)
                 + jnp.dot(hproj, wd_h_ref[...], preferred_element_type=jnp.float32)
                 + b_d_ref[...])
            s = jax.nn.sigmoid(d)

            out = (jnp.dot(s, w_o_ref[...], preferred_element_type=jnp.float32)
                   + b_o_ref[...])                                   # (Bt, L)
            out_ref[...] = out[:, None, :].astype(out_ref.dtype)

    return kernel


def wav2vec2_classification_head(features, hidden_states, mask, params, *,
                                 bt=8, compute_dtype=jnp.bfloat16,
                                 max_seq_tile=None):
    B, T_f, F = features.shape
    _, T_h, H = hidden_states.shape
    D = params["b_d"].shape[-1]
    L = params["b_o"].shape[-1]

    cdt = jnp.dtype(compute_dtype)

    # Streaming inputs in the (usually bf16) compute dtype -- halves HBM bytes.
    feats = features.astype(cdt)
    hs = hidden_states.astype(cdt)
    msk = mask.reshape(B, T_f, 1).astype(cdt)          # 0/1 -> exact in bf16

    # Heavy weights in the compute dtype (resident in VMEM once); biases stay f32.
    w_pf = params["w_pf"].astype(cdt)
    b_pf = params["b_pf"].astype(jnp.float32)
    w_ph = params["w_ph"].astype(cdt)
    b_ph = params["b_ph"].astype(jnp.float32)
    wd_f = params["wd_f"].astype(cdt)
    wd_h = params["wd_h"].astype(cdt)
    b_d = params["b_d"].astype(jnp.float32)
    w_o = params["w_o"].astype(cdt)
    b_o = params["b_o"].astype(jnp.float32)

    # >= 2 batch grid steps so the "parallel" axis shards across v7x's 2 TCs.
    Bt = max(1, min(bt, B // 2))
    nb = pl.cdiv(B, Bt)

    # ---- VMEM-budgeted sequence tiling (per-generation VMEM capacity) ----
    itemsize = cdt.itemsize
    vmem_cap = _tpu_vmem_capacity_bytes()
    vmem_limit = max(min(vmem_cap * 3 // 4, 100 * 1024 * 1024), 32 * 1024 * 1024)
    weight_bytes = 2 * itemsize * (F * F + H * H + F * D + H * D + D * L)
    bias_bytes = 2 * 4 * (F + H + D + L)
    headroom = 4 * 1024 * 1024
    stream_budget = max(vmem_limit - weight_bytes - bias_bytes - headroom,
                        2 * 1024 * 1024)
    per_t_bytes = 2 * itemsize * Bt * (H + F + 1)       # double-buffered per T row
    tt_cap = max(8, (stream_budget // per_t_bytes) // 8 * 8)
    if max_seq_tile is not None:
        tt_cap = max(8, min(tt_cap, _round_up(max_seq_tile, 8)))
    nt = max(pl.cdiv(T_h, tt_cap), pl.cdiv(T_f, tt_cap), 1)
    tt_h = _seq_tile(T_h, nt)
    tt_f = _seq_tile(T_f, nt)
    nt_h = pl.cdiv(T_h, tt_h)                            # <= nt
    nt_f = pl.cdiv(T_f, tt_f)                            # <= nt

    kernel = _make_head_kernel(t_f=T_f, t_h=T_h, tt_f=tt_f, tt_h=tt_h,
                               nt_f=nt_f, nt_h=nt_h, nt=nt)

    const2 = lambda b, t: (0, 0)                         # resident weights
    # NOTE: pipeline_mode=pl.Buffered(3) on the hidden_states spec is a possible
    # extra knob for small tiles on v5e; left at the default pending a sweep.
    out3 = pl.pallas_call(
        kernel,
        out_shape=jax.ShapeDtypeStruct((B, 1, L), jnp.float32),
        grid_spec=pltpu.PrefetchScalarGridSpec(
            num_scalar_prefetch=0,
            grid=(nb, nt),
            in_specs=[
                pl.BlockSpec((Bt, tt_f, F),
                             lambda b, t: (b, jnp.minimum(t, nt_f - 1), 0)),
                pl.BlockSpec((Bt, tt_h, H),
                             lambda b, t: (b, jnp.minimum(t, nt_h - 1), 0)),
                pl.BlockSpec((Bt, tt_f, 1),
                             lambda b, t: (b, jnp.minimum(t, nt_f - 1), 0)),
                pl.BlockSpec((F, F), const2), pl.BlockSpec((1, F), const2),
                pl.BlockSpec((H, H), const2), pl.BlockSpec((1, H), const2),
                pl.BlockSpec((F, D), const2), pl.BlockSpec((H, D), const2),
                pl.BlockSpec((1, D), const2),
                pl.BlockSpec((D, L), const2), pl.BlockSpec((1, L), const2),
            ],
            out_specs=pl.BlockSpec((Bt, 1, L), lambda b, t: (b, 0, 0)),
            scratch_shapes=[
                pltpu.VMEM((Bt, 1, F), jnp.float32),   # masked feature sum
                pltpu.VMEM((Bt, 1, H), jnp.float32),   # hidden_states sum
                pltpu.VMEM((Bt, 1, 1), jnp.float32),   # mask count
            ],
        ),
        compiler_params=pltpu.CompilerParams(
            dimension_semantics=("parallel", "arbitrary"),
            vmem_limit_bytes=int(vmem_limit),
        ),
    )(feats, hs, msk, w_pf, b_pf, w_ph, b_ph, wd_f, wd_h, b_d, w_o, b_o)

    return out3.reshape(B, L)


def reference_forward(features, hidden_states, mask, params):
    # Pure-JAX reference mirroring the PyTorch module literally
    # (project per-timestep, THEN mean; eval mode, dropout = identity).
    f = features @ params["w_pf"] + params["b_pf"]
    h = hidden_states @ params["w_ph"] + params["b_ph"]
    hmean = jnp.mean(h, axis=1)
    fmean = jnp.sum(f * mask, axis=1) / jnp.sum(mask, axis=1)
    x = jnp.concatenate([fmean, hmean], axis=1)      # cat((features, hidden_states), 1)
    w_d = jnp.concatenate([params["wd_f"], params["wd_h"]], axis=0)
    x = x @ w_d + params["b_d"]
    x = jax.nn.sigmoid(x)
    return x @ params["w_o"] + params["b_o"]


if __name__ == "__main__":
    # Small, deterministic shapes. In the real module: F=151, H=config.hidden_size=1024.
    B, T_f, T_h = 2, 12, 8
    F, H = 24, 32          # features_size, hidden_size (scaled down)
    L = 4                  # num_labels
    D = F + H

    key = jax.random.PRNGKey(0)
    ks = jax.random.split(key, 12)

    features = jax.random.normal(ks[0], (B, T_f, F), jnp.float32)
    hidden_states = jax.random.normal(ks[1], (B, T_h, H), jnp.float32)
    # padding mask: batch 0 keeps 9 steps, batch 1 keeps 7 steps
    lens = jnp.array([9, 7])
    mask = (jnp.arange(T_f)[None, :] < lens[:, None]).astype(jnp.float32)[..., None]  # (B, T_f, 1)

    scale = 0.05
    w_d_full = scale * jax.random.normal(ks[6], (D, D), jnp.float32)
    params = {
        "w_pf": scale * jax.random.normal(ks[2], (F, F), jnp.float32),
        "b_pf": scale * jax.random.normal(ks[3], (1, F), jnp.float32),
        "w_ph": scale * jax.random.normal(ks[4], (H, H), jnp.float32),
        "b_ph": scale * jax.random.normal(ks[5], (1, H), jnp.float32),
        "wd_f": w_d_full[:F, :],     # rows for the "features" half of the concat
        "wd_h": w_d_full[F:, :],     # rows for the "hidden_states" half
        "b_d": scale * jax.random.normal(ks[7], (1, D), jnp.float32),
        "w_o": scale * jax.random.normal(ks[8], (D, L), jnp.float32),
        "b_o": scale * jax.random.normal(ks[9], (1, L), jnp.float32),
    }

    ref = reference_forward(features, hidden_states, mask, params)

    # 1) f32 end-to-end, single sequence tile: exact-algorithm check.
    out_f32 = wav2vec2_classification_head(
        features, hidden_states, mask, params, compute_dtype=jnp.float32)
    out_f32 = jax.block_until_ready(out_f32)
    np.testing.assert_allclose(np.asarray(out_f32), np.asarray(ref),
                               rtol=1e-4, atol=1e-5)

    # 2) f32 with a forced tiny sequence tile: exercises the multi-step reduction
    #    (partial tail masking + clamped index for the shorter stream).
    out_tiled = wav2vec2_classification_head(
        features, hidden_states, mask, params,
        compute_dtype=jnp.float32, max_seq_tile=8)
    out_tiled = jax.block_until_ready(out_tiled)
    np.testing.assert_allclose(np.asarray(out_tiled), np.asarray(ref),
                               rtol=1e-4, atol=1e-5)

    # 3) default performance path: bf16 streaming + resident bf16 weights,
    #    f32 accumulation (loose tolerance vs the f32 reference).
    out_bf16 = wav2vec2_classification_head(features, hidden_states, mask, params)
    out_bf16 = jax.block_until_ready(out_bf16)
    np.testing.assert_allclose(np.asarray(out_bf16), np.asarray(ref),
                               rtol=3e-2, atol=3e-2)

    print("KERNEL_OK")
</pallas_src>

<mosaic_0001>
module attributes {stable_mosaic.version = 11 : i64} {
  func.func @kernel(%arg0: i32, %arg1: i32, %arg2: memref<1x12x24xf32, #tpu.memory_space<vmem>>, %arg3: memref<1x8x32xf32, #tpu.memory_space<vmem>>, %arg4: memref<1x12x1xf32, #tpu.memory_space<vmem>>, %arg5: memref<24x24xf32, #tpu.memory_space<vmem>>, %arg6: memref<1x24xf32, #tpu.memory_space<vmem>>, %arg7: memref<32x32xf32, #tpu.memory_space<vmem>>, %arg8: memref<1x32xf32, #tpu.memory_space<vmem>>, %arg9: memref<24x56xf32, #tpu.memory_space<vmem>>, %arg10: memref<32x56xf32, #tpu.memory_space<vmem>>, %arg11: memref<1x56xf32, #tpu.memory_space<vmem>>, %arg12: memref<56x4xf32, #tpu.memory_space<vmem>>, %arg13: memref<1x4xf32, #tpu.memory_space<vmem>>, %arg14: memref<1x1x4xf32, #tpu.memory_space<vmem>>, %arg15: memref<1x1x24xf32, #tpu.memory_space<vmem>>, %arg16: memref<1x1x32xf32, #tpu.memory_space<vmem>>, %arg17: memref<1x1x1xf32, #tpu.memory_space<vmem>>) attributes {dimension_semantics = [#tpu.dimension_semantics<parallel>, #tpu.dimension_semantics<arbitrary>], iteration_bounds = array<i64: 2, 1>, scalar_prefetch = 0 : i64, scratch_operands = 3 : i64, tpu.core_type = #tpu.core_type<tc>, window_params = [{transform_indices = @transform_0, window_bounds = array<i64: 1, 12, 24>}, {transform_indices = @transform_1, window_bounds = array<i64: 1, 8, 32>}, {transform_indices = @transform_2, window_bounds = array<i64: 1, 12, 1>}, {pipeline_mode = #tpu.pipeline_mode<synchronous>, transform_indices = @transform_3, window_bounds = array<i64: 24, 24>}, {pipeline_mode = #tpu.pipeline_mode<synchronous>, transform_indices = @transform_4, window_bounds = array<i64: 1, 24>}, {pipeline_mode = #tpu.pipeline_mode<synchronous>, transform_indices = @transform_5, window_bounds = array<i64: 32, 32>}, {pipeline_mode = #tpu.pipeline_mode<synchronous>, transform_indices = @transform_6, window_bounds = array<i64: 1, 32>}, {pipeline_mode = #tpu.pipeline_mode<synchronous>, transform_indices = @transform_7, window_bounds = array<i64: 24, 56>}, {pipeline_mode = #tpu.pipeline_mode<synchronous>, transform_indices = @transform_8, window_bounds = array<i64: 32, 56>}, {pipeline_mode = #tpu.pipeline_mode<synchronous>, transform_indices = @transform_9, window_bounds = array<i64: 1, 56>}, {pipeline_mode = #tpu.pipeline_mode<synchronous>, transform_indices = @transform_10, window_bounds = array<i64: 56, 4>}, {pipeline_mode = #tpu.pipeline_mode<synchronous>, transform_indices = @transform_11, window_bounds = array<i64: 1, 4>}, {transform_indices = @transform_12, window_bounds = array<i64: 1, 1, 4>}]} {
    %c0_i32 = arith.constant 0 : i32
    %0 = arith.cmpi eq, %arg1, %c0_i32 : i32
    %1 = arith.extui %0 : i1 to i32
    %c0_i32_0 = arith.constant 0 : i32
    %2 = arith.cmpi ne, %1, %c0_i32_0 : i32
    scf.if %2 {
      %cst_39 = arith.constant 0.000000e+00 : f32
      %56 = vector.broadcast %cst_39 : f32 to vector<1x1x24xf32>
      %c0_40 = arith.constant 0 : index
      %c0_41 = arith.constant 0 : index
      %c0_42 = arith.constant 0 : index
      %57 = vector.load %arg15[%c0_40, %c0_41, %c0_42] : memref<1x1x24xf32, #tpu.memory_space<vmem>>, vector<1x1x24xf32>
      tpu.vector_store %arg15[%c0_40, %c0_41, %c0_42], %56 {strides = array<i32>} : memref<1x1x24xf32, #tpu.memory_space<vmem>>, vector<1x1x24xf32>,
      %cst_43 = arith.constant 0.000000e+00 : f32
      %58 = vector.broadcast %cst_43 : f32 to vector<1x1x32xf32>
      %c0_44 = arith.constant 0 : index
      %c0_45 = arith.constant 0 : index
      %c0_46 = arith.constant 0 : index
      %59 = vector.load %arg16[%c0_44, %c0_45, %c0_46] : memref<1x1x32xf32, #tpu.memory_space<vmem>>, vector<1x1x32xf32>
      tpu.vector_store %arg16[%c0_44, %c0_45, %c0_46], %58 {strides = array<i32>} : memref<1x1x32xf32, #tpu.memory_space<vmem>>, vector<1x1x32xf32>,
      %cst_47 = arith.constant 0.000000e+00 : f32
      %60 = vector.broadcast %cst_47 : f32 to vector<1x1x1xf32>
      %c0_48 = arith.constant 0 : index
      %c0_49 = arith.constant 0 : index
      %c0_50 = arith.constant 0 : index
      %61 = vector.load %arg17[%c0_48, %c0_49, %c0_50] : memref<1x1x1xf32, #tpu.memory_space<vmem>>, vector<1x1x1xf32>
      tpu.vector_store %arg17[%c0_48, %c0_49, %c0_50], %60 {strides = array<i32>} : memref<1x1x1xf32, #tpu.memory_space<vmem>>, vector<1x1x1xf32>,
    } else {
    }
    %c0_i32_1 = arith.constant 0 : i32
    %3 = arith.minsi %arg1, %c0_i32_1 : i32
    %c12_i32 = arith.constant 12 : i32
    %4 = arith.muli %3, %c12_i32 : i32
    %5 = tpu.iota {dimensions = array<i32: 1>} : vector<1x12x1xi32>
    %6 = vector.broadcast %4 : i32 to vector<1x12x1xi32>
    %7 = arith.addi %6, %5 : vector<1x12x1xi32>
    %c12_i32_2 = arith.constant 12 : i32
    %8 = vector.broadcast %c12_i32_2 : i32 to vector<1x12x1xi32>
    %9 = arith.cmpi slt, %7, %8 : vector<1x12x1xi32>
    %c1_i32 = arith.constant 1 : i32
    %10 = arith.cmpi slt, %arg1, %c1_i32 : i32
    %11 = vector.broadcast %10 : i1 to vector<1x12x1xi1>
    %12 = arith.andi %9, %11 : vector<1x12x1xi1>
    %c0 = arith.constant 0 : index
    %c0_3 = arith.constant 0 : index
    %c0_4 = arith.constant 0 : index
    %13 = vector.load %arg4[%c0, %c0_3, %c0_4] : memref<1x12x1xf32, #tpu.memory_space<vmem>>, vector<1x12x1xf32>
    %cst = arith.constant 0.000000e+00 : f32
    %14 = vector.broadcast %cst : f32 to vector<1x12x1xf32>
    %15 = arith.select %12, %13, %14 : vector<1x12x1xi1>, vector<1x12x1xf32>
    %c0_5 = arith.constant 0 : index
    %c0_6 = arith.constant 0 : index
    %c0_7 = arith.constant 0 : index
    %16 = vector.load %arg2[%c0_5, %c0_6, %c0_7] : memref<1x12x24xf32, #tpu.memory_space<vmem>>, vector<1x12x24xf32>
    %cst_8 = arith.constant 0.000000e+00 : f32
    %17 = vector.shape_cast %12 : vector<1x12x1xi1> to vector<1x12x1xi1>
    %18 = vector.broadcast %17 : vector<1x12x1xi1> to vector<1x12x24xi1>
    %19 = vector.broadcast %cst_8 : f32 to vector<1x12x24xf32>
    %20 = arith.select %18, %16, %19 : vector<1x12x24xi1>, vector<1x12x24xf32>
    %c0_9 = arith.constant 0 : index
    %c0_10 = arith.constant 0 : index
    %c0_11 = arith.constant 0 : index
    %21 = vector.load %arg15[%c0_9, %c0_10, %c0_11] : memref<1x1x24xf32, #tpu.memory_space<vmem>>, vector<1x1x24xf32>
    %22 = vector.broadcast %15 : vector<1x12x1xf32> to vector<1x12x24xf32>
    %23 = arith.mulf %20, %22 : vector<1x12x24xf32>
    %cst_12 = arith.constant dense<0.000000e+00> : vector<1x24xf32>
    %24 = vector.multi_reduction <add>, %23, %cst_12 [1] : vector<1x12x24xf32> to vector<1x24xf32>
    %25 = vector.shape_cast %24 : vector<1x24xf32> to vector<1x1x24xf32>
    %26 = arith.addf %21, %25 : vector<1x1x24xf32>
    %c0_13 = arith.constant 0 : index
    %c0_14 = arith.constant 0 : index
    %c0_15 = arith.constant 0 : index
    %27 = vector.load %arg15[%c0_13, %c0_14, %c0_15] : memref<1x1x24xf32, #tpu.memory_space<vmem>>, vector<1x1x24xf32>
    tpu.vector_store %arg15[%c0_13, %c0_14, %c0_15], %26 {strides = array<i32>} : memref<1x1x24xf32, #tpu.memory_space<vmem>>, vector<1x1x24xf32>,
    %c0_16 = arith.constant 0 : index
    %c0_17 = arith.constant 0 : index
    %c0_18 = arith.constant 0 : index
    %28 = vector.load %arg17[%c0_16, %c0_17, %c0_18] : memref<1x1x1xf32, #tpu.memory_space<vmem>>, vector<1x1x1xf32>
    %cst_19 = arith.constant dense<0.000000e+00> : vector<1x1xf32>
    %29 = vector.multi_reduction <add>, %15, %cst_19 [1] : vector<1x12x1xf32> to vector<1x1xf32>
    %30 = vector.shape_cast %29 : vector<1x1xf32> to vector<1x1x1xf32>
    %31 = arith.addf %28, %30 : vector<1x1x1xf32>
    %c0_20 = arith.constant 0 : index
    %c0_21 = arith.constant 0 : index
    %c0_22 = arith.constant 0 : index
    %32 = vector.load %arg17[%c0_20, %c0_21, %c0_22] : memref<1x1x1xf32, #tpu.memory_space<vmem>>, vector<1x1x1xf32>
    tpu.vector_store %arg17[%c0_20, %c0_21, %c0_22], %31 {strides = array<i32>} : memref<1x1x1xf32, #tpu.memory_space<vmem>>, vector<1x1x1xf32>,
    %c0_i32_23 = arith.constant 0 : i32
    %33 = arith.minsi %arg1, %c0_i32_23 : i32
    %c8_i32 = arith.constant 8 : i32
    %34 = arith.muli %33, %c8_i32 : i32
    %35 = tpu.iota {dimensions = array<i32: 1>} : vector<1x8x1xi32>
    %36 = vector.broadcast %34 : i32 to vector<1x8x1xi32>
    %37 = arith.addi %36, %35 : vector<1x8x1xi32>
    %c8_i32_24 = arith.constant 8 : i32
    %38 = vector.broadcast %c8_i32_24 : i32 to vector<1x8x1xi32>
    %39 = arith.cmpi slt, %37, %38 : vector<1x8x1xi32>
    %c1_i32_25 = arith.constant 1 : i32
    %40 = arith.cmpi slt, %arg1, %c1_i32_25 : i32
    %41 = vector.broadcast %40 : i1 to vector<1x8x1xi1>
    %42 = arith.andi %39, %41 : vector<1x8x1xi1>
    %c0_26 = arith.constant 0 : index
    %c0_27 = arith.constant 0 : index
    %c0_28 = arith.constant 0 : index
    %43 = vector.load %arg3[%c0_26, %c0_27, %c0_28] : memref<1x8x32xf32, #tpu.memory_space<vmem>>, vector<1x8x32xf32>
    %cst_29 = arith.constant 0.000000e+00 : f32
    %44 = vector.shape_cast %42 : vector<1x8x1xi1> to vector<1x8x1xi1>
    %45 = vector.broadcast %44 : vector<1x8x1xi1> to vector<1x8x32xi1>
    %46 = vector.broadcast %cst_29 : f32 to vector<1x8x32xf32>
    %47 = arith.select %45, %43, %46 : vector<1x8x32xi1>, vector<1x8x32xf32>
    %c0_30 = arith.constant 0 : index
    %c0_31 = arith.constant 0 : index
    %c0_32 = arith.constant 0 : index
    %48 = vector.load %arg16[%c0_30, %c0_31, %c0_32] : memref<1x1x32xf32, #tpu.memory_space<vmem>>, vector<1x1x32xf32>
    %cst_33 = arith.constant dense<0.000000e+00> : vector<1x32xf32>
    %49 = vector.multi_reduction <add>, %47, %cst_33 [1] : vector<1x8x32xf32> to vector<1x32xf32>
    %50 = vector.shape_cast %49 : vector<1x32xf32> to vector<1x1x32xf32>
    %51 = arith.addf %48, %50 : vector<1x1x32xf32>
    %c0_34 = arith.constant 0 : index
    %c0_35 = arith.constant 0 : index
    %c0_36 = arith.constant 0 : index
    %52 = vector.load %arg16[%c0_34, %c0_35, %c0_36] : memref<1x1x32xf32, #tpu.memory_space<vmem>>, vector<1x1x32xf32>
    tpu.vector_store %arg16[%c0_34, %c0_35, %c0_36], %51 {strides = array<i32>} : memref<1x1x32xf32, #tpu.memory_space<vmem>>, vector<1x1x32xf32>,
    %c0_i32_37 = arith.constant 0 : i32
    %53 = arith.cmpi eq, %arg1, %c0_i32_37 : i32
    %54 = arith.extui %53 : i1 to i32
    %c0_i32_38 = arith.constant 0 : i32
    %55 = arith.cmpi ne, %54, %c0_i32_38 : i32
    scf.if %55 {
      %c0_39 = arith.constant 0 : index
      %c0_40 = arith.constant 0 : index
      %c0_41 = arith.constant 0 : index
      %56 = vector.load %arg15[%c0_39, %c0_40, %c0_41] : memref<1x1x24xf32, #tpu.memory_space<vmem>>, vector<1x1x24xf32>
      %c0_42 = arith.constant 0 : index
      %c0_43 = arith.constant 0 : index
      %c0_44 = arith.constant 0 : index
      %57 = vector.load %arg17[%c0_42, %c0_43, %c0_44] : memref<1x1x1xf32, #tpu.memory_space<vmem>>, vector<1x1x1xf32>
      %58 = vector.broadcast %57 : vector<1x1x1xf32> to vector<1x1x24xf32>
      %59 = arith.divf %56, %58 : vector<1x1x24xf32>
      %60 = vector.shape_cast %59 : vector<1x1x24xf32> to vector<1x24xf32>
      %c0_45 = arith.constant 0 : index
      %c0_46 = arith.constant 0 : index
      %c0_47 = arith.constant 0 : index
      %61 = vector.load %arg16[%c0_45, %c0_46, %c0_47] : memref<1x1x32xf32, #tpu.memory_space<vmem>>, vector<1x1x32xf32>
      %cst_48 = arith.constant 1.250000e-01 : f32
      %62 = vector.broadcast %cst_48 : f32 to vector<1x1x32xf32>
      %63 = arith.mulf %61, %62 : vector<1x1x32xf32>
      %64 = vector.shape_cast %63 : vector<1x1x32xf32> to vector<1x32xf32>
      %c0_49 = arith.constant 0 : index
      %c0_50 = arith.constant 0 : index
      %65 = vector.load %arg5[%c0_49, %c0_50] : memref<24x24xf32, #tpu.memory_space<vmem>>, vector<24x24xf32>
      %cst_51 = arith.constant dense<0.000000e+00> : vector<1x24xf32>
      %66 = tpu.matmul %60, %65, %cst_51 {dimension_numbers = #tpu.dot_dimension_numbers<[1], [0], [0], [1], [0, 0, 1, 1], [], []>} : vector<1x24xf32>, vector<24x24xf32>, vector<1x24xf32> -> vector<1x24xf32>
      %c0_52 = arith.constant 0 : index
      %c0_53 = arith.constant 0 : index
      %67 = vector.load %arg6[%c0_52, %c0_53] : memref<1x24xf32, #tpu.memory_space<vmem>>, vector<1x24xf32>
      %68 = arith.addf %66, %67 : vector<1x24xf32>
      %c0_54 = arith.constant 0 : index
      %c0_55 = arith.constant 0 : index
      %69 = vector.load %arg7[%c0_54, %c0_55] : memref<32x32xf32, #tpu.memory_space<vmem>>, vector<32x32xf32>
      %cst_56 = arith.constant dense<0.000000e+00> : vector<1x32xf32>
      %70 = tpu.matmul %64, %69, %cst_56 {dimension_numbers = #tpu.dot_dimension_numbers<[1], [0], [0], [1], [0, 0, 1, 1], [], []>} : vector<1x32xf32>, vector<32x32xf32>, vector<1x32xf32> -> vector<1x32xf32>
      %c0_57 = arith.constant 0 : index
      %c0_58 = arith.constant 0 : index
      %71 = vector.load %arg8[%c0_57, %c0_58] : memref<1x32xf32, #tpu.memory_space<vmem>>, vector<1x32xf32>
      %72 = arith.addf %70, %71 : vector<1x32xf32>
      %c0_59 = arith.constant 0 : index
      %c0_60 = arith.constant 0 : index
      %73 = vector.load %arg9[%c0_59, %c0_60] : memref<24x56xf32, #tpu.memory_space<vmem>>, vector<24x56xf32>
      %cst_61 = arith.constant dense<0.000000e+00> : vector<1x56xf32>
      %74 = tpu.matmul %68, %73, %cst_61 {dimension_numbers = #tpu.dot_dimension_numbers<[1], [0], [0], [1], [0, 0, 1, 1], [], []>} : vector<1x24xf32>, vector<24x56xf32>, vector<1x56xf32> -> vector<1x56xf32>
      %c0_62 = arith.constant 0 : index
      %c0_63 = arith.constant 0 : index
      %75 = vector.load %arg10[%c0_62, %c0_63] : memref<32x56xf32, #tpu.memory_space<vmem>>, vector<32x56xf32>
      %cst_64 = arith.constant dense<0.000000e+00> : vector<1x56xf32>
      %76 = tpu.matmul %72, %75, %cst_64 {dimension_numbers = #tpu.dot_dimension_numbers<[1], [0], [0], [1], [0, 0, 1, 1], [], []>} : vector<1x32xf32>, vector<32x56xf32>, vector<1x56xf32> -> vector<1x56xf32>
      %77 = arith.addf %74, %76 : vector<1x56xf32>
      %c0_65 = arith.constant 0 : index
      %c0_66 = arith.constant 0 : index
      %78 = vector.load %arg11[%c0_65, %c0_66] : memref<1x56xf32, #tpu.memory_space<vmem>>, vector<1x56xf32>
      %79 = arith.addf %77, %78 : vector<1x56xf32>
      %80 = arith.negf %79 : vector<1x56xf32>
      %81 = math.exp %80 : vector<1x56xf32>
      %cst_67 = arith.constant 1.000000e+00 : f32
      %82 = vector.broadcast %cst_67 : f32 to vector<1x56xf32>
      %83 = arith.addf %82, %81 : vector<1x56xf32>
      %84 = arith.divf %82, %83 : vector<1x56xf32>
      %c0_68 = arith.constant 0 : index
      %c0_69 = arith.constant 0 : index
      %85 = vector.load %arg12[%c0_68, %c0_69] : memref<56x4xf32, #tpu.memory_space<vmem>>, vector<56x4xf32>
      %cst_70 = arith.constant dense<0.000000e+00> : vector<1x4xf32>
      %86 = tpu.matmul %84, %85, %cst_70 {dimension_numbers = #tpu.dot_dimension_numbers<[1], [0], [0], [1], [0, 0, 1, 1], [], []>} : vector<1x56xf32>, vector<56x4xf32>, vector<1x4xf32> -> vector<1x4xf32>
      %c0_71 = arith.constant 0 : index
      %c0_72 = arith.constant 0 : index
      %87 = vector.load %arg13[%c0_71, %c0_72] : memref<1x4xf32, #tpu.memory_space<vmem>>, vector<1x4xf32>
      %88 = arith.addf %86, %87 : vector<1x4xf32>
      %89 = vector.shape_cast %88 : vector<1x4xf32> to vector<1x1x4xf32>
      %c0_73 = arith.constant 0 : index
      %c0_74 = arith.constant 0 : index
      %c0_75 = arith.constant 0 : index
      %90 = vector.load %arg14[%c0_73, %c0_74, %c0_75] : memref<1x1x4xf32, #tpu.memory_space<vmem>>, vector<1x1x4xf32>
      tpu.vector_store %arg14[%c0_73, %c0_74, %c0_75], %89 {strides = array<i32>} : memref<1x1x4xf32, #tpu.memory_space<vmem>>, vector<1x1x4xf32>,
    } else {
    }
    return
  }
  func.func @transform_0(%arg0: i32, %arg1: i32) -> (i32, i32, i32) {
    %c0_i32 = arith.constant 0 : i32
    %0 = arith.minsi %arg1, %c0_i32 : i32
    %c0_i32_0 = arith.constant 0 : i32
    %c0_i32_1 = arith.constant 0 : i32
    return %arg0, %0, %c0_i32_0 : i32, i32, i32
  }
  func.func @transform_1(%arg0: i32, %arg1: i32) -> (i32, i32, i32) {
    %c0_i32 = arith.constant 0 : i32
    %0 = arith.minsi %arg1, %c0_i32 : i32
    %c0_i32_0 = arith.constant 0 : i32
    %c0_i32_1 = arith.constant 0 : i32
    return %arg0, %0, %c0_i32_0 : i32, i32, i32
  }
  func.func @transform_2(%arg0: i32, %arg1: i32) -> (i32, i32, i32) {
    %c0_i32 = arith.constant 0 : i32
    %0 = arith.minsi %arg1, %c0_i32 : i32
    %c0_i32_0 = arith.constant 0 : i32
    %c0_i32_1 = arith.constant 0 : i32
    return %arg0, %0, %c0_i32_0 : i32, i32, i32
  }
  func.func @transform_3(%arg0: i32, %arg1: i32) -> (i32, i32) {
    %c0_i32 = arith.constant 0 : i32
    %c0_i32_0 = arith.constant 0 : i32
    %c0_i32_1 = arith.constant 0 : i32
    return %c0_i32, %c0_i32_0 : i32, i32
  }
  func.func @transform_4(%arg0: i32, %arg1: i32) -> (i32, i32) {
    %c0_i32 = arith.constant 0 : i32
    %c0_i32_0 = arith.constant 0 : i32
    %c0_i32_1 = arith.constant 0 : i32
    return %c0_i32, %c0_i32_0 : i32, i32
  }
  func.func @transform_5(%arg0: i32, %arg1: i32) -> (i32, i32) {
    %c0_i32 = arith.constant 0 : i32
    %c0_i32_0 = arith.constant 0 : i32
    %c0_i32_1 = arith.constant 0 : i32
    return %c0_i32, %c0_i32_0 : i32, i32
  }
  func.func @transform_6(%arg0: i32, %arg1: i32) -> (i32, i32) {
    %c0_i32 = arith.constant 0 : i32
    %c0_i32_0 = arith.constant 0 : i32
    %c0_i32_1 = arith.constant 0 : i32
    return %c0_i32, %c0_i32_0 : i32, i32
  }
  func.func @transform_7(%arg0: i32, %arg1: i32) -> (i32, i32) {
    %c0_i32 = arith.constant 0 : i32
    %c0_i32_0 = arith.constant 0 : i32
    %c0_i32_1 = arith.constant 0 : i32
    return %c0_i32, %c0_i32_0 : i32, i32
  }
  func.func @transform_8(%arg0: i32, %arg1: i32) -> (i32, i32) {
    %c0_i32 = arith.constant 0 : i32
    %c0_i32_0 = arith.constant 0 : i32
    %c0_i32_1 = arith.constant 0 : i32
    return %c0_i32, %c0_i32_0 : i32, i32
  }
  func.func @transform_9(%arg0: i32, %arg1: i32) -> (i32, i32) {
    %c0_i32 = arith.constant 0 : i32
    %c0_i32_0 = arith.constant 0 : i32
    %c0_i32_1 = arith.constant 0 : i32
    return %c0_i32, %c0_i32_0 : i32, i32
  }
  func.func @transform_10(%arg0: i32, %arg1: i32) -> (i32, i32) {
    %c0_i32 = arith.constant 0 : i32
    %c0_i32_0 = arith.constant 0 : i32
    %c0_i32_1 = arith.constant 0 : i32
    return %c0_i32, %c0_i32_0 : i32, i32
  }
  func.func @transform_11(%arg0: i32, %arg1: i32) -> (i32, i32) {
    %c0_i32 = arith.constant 0 : i32
    %c0_i32_0 = arith.constant 0 : i32
    %c0_i32_1 = arith.constant 0 : i32
    return %c0_i32, %c0_i32_0 : i32, i32
  }
  func.func @transform_12(%arg0: i32, %arg1: i32) -> (i32, i32, i32) {
    %c0_i32 = arith.constant 0 : i32
    %c0_i32_0 = arith.constant 0 : i32
    %c0_i32_1 = arith.constant 0 : i32
    return %arg0, %c0_i32, %c0_i32_0 : i32, i32, i32
  }
}

</mosaic_0001>

<bundles_post_ra>
// kernel: tpu_custom_call.1
= control target key start
LH: loop header
LB: loop body
LE: loop exit
PB: predicated region body
PF: predicated region fallthrough
CT: control target
= control target key end

     0   :  { %s1385_s0 = inlined_call_operand.vmem [shape: f32[2,12,24], index: 0, kind: input, shape index: {}]   ;;  %s1386_s1 = inlined_call_operand.vmem [shape: f32[2,8,32], index: 1, kind: input, shape index: {}]   ;;  %s1387_s2 = inlined_call_operand.vmem [shape: f32[2,12,1], index: 2, kind: input, shape index: {}]   ;;  %s1388_s3 = inlined_call_operand.vmem [shape: f32[24,24], index: 3, kind: input, shape index: {}]   ;;  %s1389_s4 = inlined_call_operand.vmem [shape: f32[1,24], index: 4, kind: input, shape index: {}]   ;;  %s1390_s5 = inlined_call_operand.vmem [shape: f32[32,32], index: 5, kind: input, shape index: {}]   ;;  %s1391_s6 = inlined_call_operand.vmem [shape: f32[1,32], index: 6, kind: input, shape index: {}]   ;;  %s1392_s7 = inlined_call_operand.vmem [shape: f32[24,56], index: 7, kind: input, shape index: {}]   ;;  %s1393_s8 = inlined_call_operand.vmem [shape: f32[32,56], index: 8, kind: input, shape index: {}]   ;;  %s1394_s9 = inlined_call_operand.vmem [shape: f32[1,56], index: 9, kind: input, shape index: {}]   ;;  %s1395_s10 = inlined_call_operand.vmem [shape: f32[56,4], index: 10, kind: input, shape index: {}]   ;;  %s1396_s11 = inlined_call_operand.vmem [shape: f32[1,4], index: 11, kind: input, shape index: {}]   ;;  %s1397_s12 = inlined_call_operand.hbm [shape: f32[2,1,4], index: 12, kind: output, shape index: {}]  }
   0x1   :  { %1398 = sst [smem:[#allocation8_spill]] %s1385_s0 }
   0x2   :  { %1399 = sst [smem:[#allocation9_spill]] %s1386_s1 }
   0x3   :  { %1400 = sst [smem:[#allocation10_spill]] %s1387_s2 }
   0x4   :  { %1401 = sst [smem:[#allocation11_spill]] %s1388_s3 }
   0x5   :  { %17 = vsyncpa [#allocation6], 0 }
   0x6   :  { %19 = vsyncpa [#allocation6 + $0x1], 0  ;;  %s1185_s21 = smov 0   ;;  %s1187_s22 = smov 0  }
   0x7   :  { %s1189_s23 = smov 0   ;;  %s1191_s24 = smov 0  }
   0x8   :  { %s1193_s25 = smov 0   ;;  %s1195_s26 = smov 0  }
   0x9 LB: > { %s953_s27 = sadd.s32 4294967295, %s1116_s26   ;;  %s954_s28 = sadd.s32 4294967294, %s1116_s26   ;;  %s1116_s26 = sphi %s1195_s26, %s25_s26   ;;  %s1112_s25 = sphi %s1193_s25, %s1412_s25   ;;  %s1108_s24 = sphi %s1191_s24, %s1411_s24   ;;  %s1104_s23 = sphi %s1189_s23, %s1410_s23   ;;  %s1100_s22 = sphi %s1187_s22, %s1409_s22   ;;  %s1096_s21 = sphi %s1185_s21, %s1408_s21  }
   0xa   : > { %s37_s29 = sadd.s32 1, %s1112_s25  ;;  %s329_s30 = sadd.s32 1, %s1104_s23 }
   0xb   : > { %p39_p0 = scmp.ge.s32.totalorder %s37_s29, 2  ;;  %p339_p1 = scmp.ne.s32.totalorder %s1104_s23, %s1100_s22 }
   0xc   : > { %p340_p2 = scmp.eq.s32.totalorder %s953_s27, 1  ;;  %p345_p3 = scmp.ne.s32.totalorder %s1100_s22, %s1096_s21 }
   0xd   : > { %s1414_s29 = smov (%p39_p0, %s37_s29), 0  ;;  %p346_p5 = scmp.eq.s32.totalorder %s954_s28, 1 }
   0xe   : > { %p1225_p4 = por %p340_p2, %p339_p1  ;;  %s326_s14 = ssub.s32 %s1112_s25, %s1414_s29 }
   0xf   : > { %p957_p6 = scmp.ge.s32.totalorder %s1116_s26, 1  ;;  %p327_p7 = scmp.eq.s32.totalorder %s326_s14, 0 }
  0x10   : > { %p1232_p8 = por %p346_p5, %p345_p3  ;;  %p439_p9 = scmp.lt.s32.totalorder %s1116_s26, 3 }
  0x11   : > { %s1238_s16 = scalar_select %p327_p7, %s1104_s23, %s329_s30  }
  0x12   : > { %p440_p10 = pnand %p957_p6, %p439_p9 }
  0x13   : > { %p509_p11 = scmp.lt.s32.totalorder (!%p440_p10), %s1108_s24, 1  ;;  %s1404_s2 = sld [smem:[#allocation10_spill]] (!%p440_p10) }
  0x14   : > { %443 = sbr.rel (%p440_p10) target bundleno = 623 (0x26f), region = 68  ;;  %s1405_s1 = sld [smem:[#allocation9_spill]] (!%p440_p10) }
  0x15   : > { %s1406_s0 = sld [smem:[#allocation8_spill]] (!%p440_p10)  ;;  %s847_s30 = scalar_lea.hbm (!%p440_p10), %s1397_s12, %s1108_s24 }
  0x16   : > { %s1407_s3 = sld [smem:[#allocation11_spill]] (!%p440_p10) }
  0x19   : > { %vm553_vm0 = vcmask 0   ;;  %v1118_v0 = vmov 0   ;;  %v1119_v1 = vmov 0.0   ;;  %v558_v2 = vlaneseq  ;;  %s1243_s17 = scalar_select %p509_p11, %s1108_s24, 1  ;;  %v705_v35 = vld [vmem:[%s1390_s5 + $0x18] sm:$0xff]  ;;  %v704_v46 = vld [vmem:[%s1390_s5 + $0x10] sm:$0xff] }
  0x1a   : > { %1030 = vset.pattern.permute.xlu0 %v1118_v0  ;;  %554 = vst.msk [vmem:[#allocation4] sm:$0x1] %vm553_vm0, %v1119_v1  ;;  %1031 = vset.pattern.permute.xlu1 %v1118_v0  ;;  %vm612_vm1 = vcmask 7168   ;;  %vm614_vm2 = vcmask 3072   ;;  %vm549_vm4 = vcmask 188416   ;;  %vm636_vm5 = vcmask 261120  }
  0x1b   : > { %v559_v3 = vshrl.u32 %v558_v2, 7  ;;  %s971_s18 = sshll.u32 %s1243_s17, 4  ;;  %550 = vst.msk [vmem:[#allocation2] sm:$0x1] %vm549_vm4, %v1119_v1  ;;  %s960_s28 = sshll.u32 %s1243_s17, 3  ;;  %vm551_vm6 = vcmask 253952   ;;  %722 = vmatpush.msra.mxu1 %v705_v35 }
  0x1c   : > { %s541_s27 = scalar_lea.vmem %s1404_s2, %s971_s18  ;;  %s528_s19 = scalar_lea.vmem %s1405_s1, %s960_s28  ;;  %552 = vst.msk [vmem:[#allocation3] sm:$0x1] %vm551_vm6, %v1119_v1  ;;  %vm597_vm7 = vcmask 195584   ;;  %v677_v31 = vld [vmem:[%s1407_s3 + $0x10] sm:$0xff]  ;;  %v676_v32 = vld [vmem:[%s1407_s3 + $0x8] sm:$0xff]  ;;  %vm599_vm8 = vcmask 191488  }
  0x1d   : > { %v560_v4 = vadd.s32 8, %v559_v3  ;;  %v572_v5 = vld [vmem:[%s541_s27] sm:$0xff]  ;;  %v573_v6 = vld [vmem:[%s541_s27 + $0x8] sm:$0xf]  ;;  %s516_s2 = scalar_lea.vmem %s1406_s0, %s971_s18  ;;  %695 = vmatpush.msra.mxu3 %v677_v31  ;;  %723 = vmatpush.msra.mxu1 %v704_v46  ;;  %v732_v49 = vld [vmem:[%s1392_s7 + $0x10] sm:$0xff]  ;;  %s504_s27 = sand.u32 1, %s1100_s22  }
  0x1e   : > { %587 = vperm.xlu0 %1030, %v572_v5   ;;  %v613_v7 = vsel %vm612_vm1, %v572_v5, 0.0  ;;  %v631_v20 = vld [vmem:[%s528_s19] sm:$0xff]  ;;  %v577_v26 = vld [vmem:[%s516_s2 + $0x8] sm:$0xf]  ;;  %v736_v50 = vld [vmem:[%s1393_s8 + $0x18] sm:$0xff]  ;;  %s851_s19 = sshll.u32 %s847_s30, 4  ;;  %s852_s19 = int_to_ptr.hbm [resolvable:$true] %s851_s19 }
  0x1f   : > { %vm565_vm3 = vcmp.lt.s32.totalorder %v560_v4, 12  ;;  %v637_v21 = vsel %vm636_vm5, %v631_v20, 0.0  ;;  %v576_v25 = vld [vmem:[%s516_s2] sm:$0xff]  ;;  %696 = vmatpush.msra.mxu3 %v676_v32  ;;  %v703_v47 = vld [vmem:[%s1390_s5 + $0x8] sm:$0xff]  ;;  %v735_v51 = vld [vmem:[%s1393_s8 + $0x10] sm:$0xff]  ;;  %752 = vmatpush.msra.mxu2 %v736_v50  ;;  %s505_s2 = scalar_lea.vmem [#allocation5], %s504_s27 }
  0x20   : > { %v575_v8 = vsel %vm565_vm3, %v573_v6, 0.0  ;;  %v638_v22 = vrot.slane %v637_v21, 4  ;;  %v583_v30 = vsel %vm565_vm3, %v577_v26, 0.0  ;;  %v675_v37 = vld [vmem:[%s1407_s3] sm:$0xff]  ;;  %v731_v53 = vld [vmem:[%s1392_s7 + $0x8] sm:$0xff]  ;;  %724 = vmatpush.msra.mxu1 %v703_v47  ;;  %v810_v20 = vld [vmem:[%s1395_s10 + $0x30] sm:$0xff] }
  0x21   : > { %v615_v9 = vsel %vm614_vm2, %v575_v8, 0.0  ;;  %v611_v16 = vld [vmem:[#allocation4] sm:$0x1]  ;;  %697 = vmatpush.msra.mxu3 %v675_v37  ;;  %753 = vmatpush.msra.mxu2 %v735_v51  ;;  %s849_s14 = sshll.u32 %s505_s2, 4  ;;  %vm836_vm2 = vcmask 24576   ;;  %s839_s20 = scalar_lea.sflag [#allocation6], %s504_s27  ;;  %s850_s14 = int_to_ptr.vmem [resolvable:$true] %s849_s14 }
  0x22   : > { %v616_v10 = vadd.f32 %v615_v9, %v613_v7  ;;  %v639_v24 = vadd.f32 %v638_v22, %v637_v21  ;;  %v702_v52 = vld [vmem:[%s1390_s5] sm:$0xff]  ;;  %v809_v21 = vld [vmem:[%s1395_s10 + $0x28] sm:$0xff]  ;;  %825 = vmatpush.msra.mxu0 %v810_v20  ;;  %s1052_s1 = sshra.s32 %s852_s19, 4  ;;  %s1058_s17 = scalar_lea.hbm %s1397_s12, 2  ;;  %s1053_s1 = int_to_ptr.hbm [resolvable:$true] %s1052_s1 }
  0x23   : > { %v635_v40 = vld [vmem:[#allocation3] sm:$0x1]  ;;  %776 = vmatpush.msrb.mxu3 %v732_v49  ;;  %725 = vmatpush.msra.mxu1 %v702_v52  ;;  %v584_v58 = vld [vmem:[#allocation2] sm:$0x1]  ;;  %s1054_s3 = scalar_lea.hbm %s1053_s1, 1  ;;  %p1059_p1 = scmp.lt.s32.totalorder %s1053_s1, %s1397_s12 }
  0x24   : > { %v617_v11 = vrot.slane %v616_v10, 4  ;;  %v640_v27 = vrot.slane %v639_v24, 2  ;;  %v808_v22 = vld [vmem:[%s1395_s10 + $0x20] sm:$0xff]  ;;  %826 = vmatpush.msra.mxu0 %v809_v21  ;;  %p1055_p12 = scmp.ne.s32.totalorder %s1053_s1, %s1054_s3  ;;  %p1060_p2 = scmp.lt.s32.totalorder %s1058_s17, %s1054_s3 }
  0x25   : > { %777 = vmatpush.msrb.mxu3 %v731_v53  ;;  %v804_v26 = vld [vmem:[%s1395_s10] sm:$0xff] }
  0x26   : > { %v618_v12 = vadd.f32 %v617_v11, %v616_v10  ;;  %592 = vperm.xlu0 %1030, %v575_v8   ;;  %v641_v29 = vadd.f32 %v640_v27, %v639_v24  ;;  %v734_v11 = vld [vmem:[%s1393_s8 + $0x8] sm:$0xff]  ;;  %827 = vmatpush.msra.mxu0 %v808_v22  ;;  %v806_v24 = vld [vmem:[%s1395_s10 + $0x10] sm:$0xff]  ;;  %p1056_p13 = pnand %p1055_p12, %p1225_p4  ;;  %p1061_p3 = por %p1060_p2, %p1059_p1 }
  0x27   : > { %754 = vmatpush.msra.mxu2 %v734_v11 }
  0x28   : > { %v619_v13 = vrot.slane %v618_v12, 2  ;;  %v642_v33 = vrot.slane %v641_v29, 1  ;;  %p1057_p0 = pneg %p1056_p13 }
  0x2a   : > { %v620_v14 = vadd.f32 %v619_v13, %v618_v12  ;;  %v643_v39 = vadd.f32 %v642_v33, %v641_v29  ;;  %v706_v12 = vld [vmem:[%s1391_s6] sm:$0x1]  ;;  %p1062_p5 = pnand %p1061_p3, %p1057_p0 }
  0x2b   : > { %v783_v29 = vld [vmem:[%s1394_s9] sm:$0x1] }
  0x2c   : > { %v621_v15 = vrot.slane %v620_v14, 1  ;;  %v644_v42 = vadd.f32 %v643_v39, %v635_v40 }
  0x2e   : > { %v622_v17 = vadd.f32 %v621_v15, %v620_v14  ;;  %646 = vst.msk [vmem:[#allocation3] sm:$0x1] %vm551_vm6, %v644_v42  ;;  %v730_v15 = vld [vmem:[%s1392_s7] sm:$0xff] }
  0x2f   : > { %778 = vmatpush.msrb.mxu3 %v730_v15 }
  0x30   : > { %v623_v18 = vadd.f32 %v622_v17, %v611_v16  ;;  %v733_v16 = vld [vmem:[%s1393_s8] sm:$0xff] }
  0x31   : > { %755 = vmatpush.msra.mxu2 %v733_v16  ;;  %v678_v17 = vld [vmem:[%s1389_s4] sm:$0x1] }
  0x32   : > { %625 = vst.msk [vmem:[#allocation4] sm:$0x1] %vm553_vm0, %v623_v18  ;;  %vm812_vm0 = vcmask 457728  }
  0x35   : > { %v673_v55 = vld [vmem:[#allocation3] sm:$0x1] }
  0x36   : > { %v674_v56 = vmul.f32 0.125, %v673_v55 }
  0x38   : > { %964 = vmatmul.msk.f32.vlgmr.msra.gmra.mxu1 %vm636_vm5, %v674_v56 }
  0x39   : > { %v651_v19 = vld [vmem:[#allocation4] sm:$0x1] }
  0x3a   : > { %654 = vperm.xlu1 %1031, %v651_v19  }
  0x90   : > { %v588_v23 = vpop.permute.xlu0 %587 }
  0x91   : > { %v595_v28 = vmul.f32 %v588_v23, %v576_v25  ;;  %v807_v23 = vld [vmem:[%s1395_s10 + $0x18] sm:$0xff]  ;;  %v805_v25 = vld [vmem:[%s1395_s10 + $0x8] sm:$0xff] }
  0x92   : > { %828 = vmatpush.msra.mxu0 %v807_v23 }
  0x93   : > { %v598_v38 = vsel %vm597_vm7, %v595_v28, 0.0 }
  0x94   : > { %829 = vmatpush.msra.mxu0 %v806_v24 }
  0x96   : > { %830 = vmatpush.msra.mxu0 %v805_v25 }
  0x98   : > { %v593_v34 = vpop.permute.xlu0 %592  ;;  %831 = vmatpush.msra.mxu0 %v804_v26 }
  0x99   : > { %v596_v36 = vmul.f32 %v593_v34, %v583_v30 }
  0x9b   : > { %v600_v41 = vsel %vm599_vm8, %v596_v36, 0.0 }
  0x9c   : > { %v601_v43 = vadd.f32 %v600_v41, %v598_v38 }
  0x9e   : > { %v602_v44 = vrot.slane %v601_v43, 4 }
  0xa0   : > { %v603_v45 = vadd.f32 %v602_v44, %v601_v43 }
  0xa2   : > { %v604_v48 = vrot.slane %v603_v45, 2 }
  0xa4   : > { %v605_v54 = vadd.f32 %v604_v48, %v603_v45  ;;  %v811_v45 = vld [vmem:[%s1396_s11] sm:$0x1] }
  0xa6   : > { %v606_v57 = vrot.slane %v605_v54, 1 }
  0xa8   : > { %v607_v59 = vadd.f32 %v606_v57, %v605_v54 }
  0xaa   : > { %v608_v60 = vadd.f32 %v607_v59, %v584_v58 }
  0xac   : > { %v655_v61 = vpop.permute.xlu1 %654  ;;  %610 = vst.msk [vmem:[#allocation2] sm:$0x1] %vm549_vm4, %v608_v60 }
  0xad   : > { %v657_v62 = vperm.slane %v655_v61, 0 }
  0xaf   : > { %1032 = vrcp.f32 %v657_v62  ;;  %v669_v2 = vand.u32 2147483648, %v657_v62  ;;  %v667_v4 = vand.u32 2147483647, %v657_v62  ;;  %vm663_vm10 = vweird.f32 %v657_v62 }
  0xb1   : > { %v670_v6 = vor.u32 1.1754944e-38, %v669_v2  ;;  %vm668_vm12 = vcmp.eq.f32.partialorder %v667_v4, 8.507059e+37 }
  0xb3   : > { %v650_v8 = vld [vmem:[#allocation2] sm:$0x1] }
  0xb5   : > { %v1033_v63 = vpop.eup %1032  ;;  %v727_v13 = vpop.f32.mrf.mxu1 }
  0xb6   : > { %v659_v0 = vmul.f32 %v1033_v63, %v657_v62  ;;  %vm664_vm9 = vweird.f32 %v1033_v63  ;;  %v728_v14 = vadd.f32 %v727_v13, %v706_v12 }
  0xb7   : > { %vm665_vm11 = vmor %vm663_vm10, %vm664_vm9 }
  0xb8   : > { %v660_v1 = vsub.f32 1.0, %v659_v0  ;;  %965 = vmatmul.msk.f32.vlgmr.msra.gmra.mxu2 %vm636_vm5, %v728_v14 }
  0xba   : > { %v661_v3 = vmul.f32 %v1033_v63, %v660_v1 }
  0xbc   : > { %v662_v5 = vadd.f32 %v1033_v63, %v661_v3 }
  0xbe   : > { %v666_v7 = vsel %vm665_vm11, %v1033_v63, %v662_v5 }
  0xbf   : > { %v671_v9 = vsel %vm668_vm12, %v670_v6, %v666_v7 }
  0xc0   : > { %v672_v10 = vmul.f32 %v671_v9, %v650_v8 }
  0xc2   : > { %963 = vmatmul.msk.f32.vlgmr.msra.gmra.mxu3 %vm597_vm7, %v672_v10 }
 0x13b   : > { %v757_v27 = vpop.f32.mrf.mxu2 }
 0x145   : > { %v699_v18 = vpop.f32.mrf.mxu3 }
 0x146   : > { %v700_v19 = vadd.f32 %v699_v18, %v678_v17 }
 0x148   : > { %966 = vmatmul.msk.f32.vlgmr.msrb.gmra.mxu3 %vm597_vm7, %v700_v19 }
 0x1cb   : > { %v780_v28 = vpop.f32.mrf.mxu3 }
 0x1cc   : > { %v781_v30 = vadd.f32 %v780_v28, %v757_v27 }
 0x1ce   : > { %v784_v31 = vadd.f32 %v783_v29, %v781_v30 }
 0x1d0   : > { %v967_v32 = vmul.f32 -1.442695, %v784_v31 }
 0x1d2   : > { %1034 = vpow2.f32 %v967_v32 }
 0x1d8   : > { %v1035_v33 = vpop.eup %1034 }
 0x1d9   : > { %v788_v34 = vadd.f32 1.0, %v1035_v33 }
 0x1db   : > { %1036 = vrcp.f32 %v788_v34  ;;  %v800_v38 = vand.u32 2147483648, %v788_v34  ;;  %v798_v40 = vand.u32 2147483647, %v788_v34  ;;  %vm794_vm14 = vweird.f32 %v788_v34 }
 0x1dd   : > { %v801_v42 = vor.u32 1.1754944e-38, %v800_v38  ;;  %vm799_vm1 = vcmp.eq.f32.partialorder %v798_v40, 8.507059e+37 }
 0x1e1   : > { %v1037_v35 = vpop.eup %1036 }
 0x1e2   : > { %v790_v36 = vmul.f32 %v1037_v35, %v788_v34  ;;  %vm795_vm13 = vweird.f32 %v1037_v35 }
 0x1e3   : > { %vm796_vm15 = vmor %vm794_vm14, %vm795_vm13 }
 0x1e4   : > { %v791_v37 = vsub.f32 1.0, %v790_v36 }
 0x1e6   : > { %v792_v39 = vmul.f32 %v1037_v35, %v791_v37 }
 0x1e8   : > { %v793_v41 = vadd.f32 %v1037_v35, %v792_v39 }
 0x1ea   : > { %v797_v43 = vsel %vm796_vm15, %v1037_v35, %v793_v41 }
 0x1eb   : > { %v802_v44 = vsel %vm799_vm1, %v801_v42, %v797_v43 }
 0x1ec   : > { %968 = vmatmul.msk.f32.vlgmr.msra.gmra.mxu0 %vm812_vm0, %v802_v44 }
 0x269   : > { %v833_v46 = vpop.f32.mrf.mxu0 }
 0x26a   : > { %v834_v47 = vadd.f32 %v833_v46, %v811_v45 }
 0x26c   : > { %837 = vst.msk [vmem:[%s505_s2] sm:$0x1] %vm836_vm2, %v834_v47 }
 0x26d   : > { %1065 = shalt.err (!%p1062_p5)
}
 0x26e   : > { %973 = dma.vmem_to_hbm [thread:$0]  (%p1225_p4), %s850_s14, 16, %s852_s19, %s839_s20  }
 0x26f PF: > { %p979_p6 = scmp.ge.s32.totalorder %s1116_s26, 2  ;;  %s863_s27 = sand.u32 1, %s1096_s21  }
 0x270   : > { %s864_s18 = scalar_lea.sflag [#allocation6], %s863_s27 }
 0x271   : > { %p976_p7 = pnand %p979_p6, %p1232_p8 }
 0x273   : > { %p977_p9 = pneg %p976_p7 }
 0x275   : > { %1091 = dma.done.wait (%p977_p9), %s864_s18, 16  }
 0x276   : > { %1093 = vsyncadd (%p977_p9), %s864_s18, 4294967280  ;;  %s25_s26 = sadd.s32 1, %s1116_s26   ;;  %s1408_s21 = smov %s1100_s22 }
 0x277   : > { %p22_p10 = scmp.ge.s32.totalorder %s25_s26, 4   ;;  %s1409_s22 = smov %s1104_s23 }
 0x278   : > { %s1410_s23 = smov %s1238_s16  ;;  %s1411_s24 = smov %s1112_s25 }
 0x279   : > { %s1412_s25 = smov %s1414_s29  ;;  %24 = sbr.rel (!%p22_p10) target bundleno = 9 (0x9), region = 117 }
 0x27e   :  { %869 = vsyncpa [#allocation6], 1 }
 0x27f   :  { %871 = vsyncpa [#allocation6 + $0x1], 1 }

</bundles_post_ra>
